<compile_context>
chip_gen: v7x
topology: tpu7x:2x2x1
jax: 0.10.0
libtpu: 0.0.40
codegen_flags: <defaults>
</compile_context>

<pallas_src>
import functools

import jax
import jax.numpy as jnp
from jax import lax
from jax.experimental import pallas as pl
from jax.experimental.pallas import tpu as pltpu


def _excpr_kernel(choice_ref,         # SMEM (1,) int32   : random shift in [1, r]
                  y_pred_ref,         # VMEM (tb, K) f32  : class logits tile
                  labels_ref,         # VMEM (tb, 1) i32  : class labels tile
                  protos_ref,         # VMEM (tb, J) f32  : gathered prototypes (original column order)
                  ps_ref,             # VMEM (tb, J) f32  : per-row sorted prototypes
                  fs_ref,             # VMEM (tb, J) f32  : features permuted by the same sort
                  out_ref,            # VMEM (1, 1) f32   : scalar loss (resident accumulator)
                  g_ref,              # VMEM (J, J) f32   : P_unit^T P_unit accumulator (Frobenius form)
                  pad_ref,            # VMEM (tb, Jp) f32 : lane-dense zero-padded diffs buffer
                  *, alpha, beta, gamma, zeta, nu, prototype_warm, bs, true_j):
    eps2 = 1e-24                      # (F.normalize eps = 1e-12) ** 2
    i = pl.program_id(0)
    tb, K = y_pred_ref.shape
    J = true_j

    @pl.when(i == 0)
    def _init():
        out_ref[...] = jnp.zeros_like(out_ref)
        g_ref[...] = jnp.zeros_like(g_ref)
        # Pad lanes [J, Jp) stay zero for every tile: only [:, :J] is rewritten
        # below, so the dynamic roll wrap-around always multiplies by 0.
        pad_ref[...] = jnp.zeros_like(pad_ref)

    # ---------------- cross-entropy, per-row (batch mean folds into 1/bs) ----------------
    logits = y_pred_ref[...]
    labels = labels_ref[...]                                          # (tb, 1) int32, must be in [0, K)
    col_k = lax.broadcasted_iota(jnp.int32, (tb, K), 1)
    tgt = jnp.sum(jnp.where(col_k == labels, logits, 0.0), axis=1, keepdims=True)
    m = jnp.max(logits, axis=1, keepdims=True)
    lse = jnp.log(jnp.sum(jnp.exp(logits - m), axis=1, keepdims=True)) + m
    row = (alpha / bs) * (lse - tgt)                                  # (tb, 1) fused-reduction column

    # ---------------- L2 normalisation (F.normalize, dim=1); one rsqrt per row ----------------
    # Row sum-of-squares is permutation-invariant, so the sorted copies share p_inv.
    ps = ps_ref[...]
    fs = fs_ref[...]
    p_inv = lax.rsqrt(jnp.maximum(jnp.sum(ps * ps, axis=1, keepdims=True), eps2))
    f_inv = lax.rsqrt(jnp.maximum(jnp.sum(fs * fs, axis=1, keepdims=True), eps2))
    ps_unit = ps * p_inv                                              # sorted unit prototypes
    d = fs * f_inv - ps_unit                                          # (tb, J), reused twice below

    if prototype_warm:
        # Reference adds loss_proto twice (inside the `if` and once after it);
        # sum of squared diffs is permutation-invariant, so the sorted pair is used.
        row = row + (2.0 * beta / bs) * jnp.sum(d * d, axis=1, keepdims=True)

    # ---------------- off-diagonal cosine penalty, Frobenius form ----------------
    # sum_{i,j} cs[i,j]^2 == ||P_unit^T P_unit||_F^2, accumulated over batch tiles
    # in a fixed (J,J) scratch (O(bs*J^2) FLOPs, footprint independent of bs).
    p_unit = protos_ref[...] * p_inv                                  # original column order (needed for P^T P)
    g_ref[...] = g_ref[...] + lax.dot_general(
        p_unit, p_unit, (((0,), (0,)), ((), ())),
        preferred_element_type=jnp.float32)
    # Subtract the exact diagonal contribution sum_i ||p_i||^4 (handles all-zero
    # prototype rows correctly instead of assuming diag(cs) == 1).
    rn = jnp.sum(p_unit * p_unit, axis=1, keepdims=True)              # ~1 per unit row
    row = row - (zeta / (bs * (bs - 1.0))) * (rn * rn)

    # ---------------- shifted covariance term (sorted order), runtime `choice` ----------------
    choice = choice_ref[0]
    diffs = ps_unit * d                                               # (tb, J)
    pad_ref[:, :J] = diffs                                            # widen to lane-dense Jp; pad lanes stay 0
    dp = pad_ref[...]                                                 # (tb, Jp)
    prod = dp * pltpu.roll(dp, choice, axis=1)
    if nu == 0:
        term = jnp.abs(prod)
    elif nu == 1:
        term = jnp.maximum(prod, 0.0)
    elif nu == -1:
        term = jnp.maximum(-prod, 0.0)
    elif nu == 2:
        term = prod
    elif nu == 3:
        term = -prod
    else:
        raise ValueError("Select a valid value for nu from [-1, 0, 1, 2, 3]")
    # torch.mean over the padded (bs, J + choice) tensor
    cov_scale = (gamma / bs) / (float(J) + choice.astype(jnp.float32))
    row = row + cov_scale * jnp.sum(term, axis=1, keepdims=True)

    # One cross-sublane reduction per tile, accumulated into the resident output.
    out_ref[...] = out_ref[...] + jnp.sum(row)

    @pl.when(i == pl.num_programs(0) - 1)
    def _finalize():
        g = g_ref[...]
        out_ref[...] = out_ref[...] + (zeta / (bs * (bs - 1.0))) * jnp.sum(g * g)


@functools.partial(
    jax.jit,
    static_argnames=("alpha", "beta", "gamma", "zeta", "r", "nu", "prototype_warm"))
def excpr_loss(feature_vec, y_pred, y_targ, prototypes, choice, *,
               alpha=1.0, beta=0.2, gamma=300000.0, zeta=0.2,
               r=20, nu=-1, prototype_warm=0):
    """exCPRLoss forward.  `choice` is a traced int scalar in [1, r]."""
    bs, J = feature_vec.shape
    K = y_pred.shape[1]
    if bs < 2:
        raise ValueError("exCPRLoss requires bs >= 2 (cosine term divides by bs-1).")
    if nu not in (-1, 0, 1, 2, 3):
        raise ValueError("Select a valid value for nu from [-1, 0, 1, 2, 3]")

    # Lane-dense padded width for the shifted-covariance roll; Jp >= J + r
    # guarantees the dynamic roll never wraps non-zero data back into live lanes.
    Jp = -(-(J + r) // 128) * 128
    assert Jp >= J + r

    # ---- plain-JAX glue; fused into the same jit as the kernel (one dispatch) ----
    feature_vec = feature_vec.astype(jnp.float32)
    y_pred = y_pred.astype(jnp.float32)
    # Precondition (same as torch): labels must lie in [0, K); out-of-range
    # labels would silently zero the target logit.  TODO(synk): add a checkify
    # assert if this wrapper is ever fed untrusted labels.
    labels = y_targ.astype(jnp.int32).reshape(bs, 1)
    protos_cur = prototypes[y_targ].astype(jnp.float32)               # (bs, J)
    # TODO(synk): per-row argsort + gather (torch.sort) has no Pallas TPU
    # primitive; kept in XLA (argsort of raw rows == argsort of unit rows).
    sort_idx = jnp.argsort(protos_cur, axis=1)
    protos_sorted = jnp.take_along_axis(protos_cur, sort_idx, axis=1)  # (bs, J)
    feat_sorted = jnp.take_along_axis(feature_vec, sort_idx, axis=1)   # (bs, J)
    choice_arr = jnp.clip(jnp.asarray(choice, jnp.int32), 1, r).reshape(1)

    # Batch tile: <=256 rows keeps the live (tile, J)/(tile, Jp) temporaries off
    # the vreg-spill path and the per-tile VMEM footprint far under v7x's 64 MiB.
    tile_bs = bs
    for cand in (256, 128, 64, 32, 16, 8):
        if bs % cand == 0:
            tile_bs = cand
            break
    n_tiles = bs // tile_bs

    kernel = functools.partial(
        _excpr_kernel, alpha=float(alpha), beta=float(beta), gamma=float(gamma),
        zeta=float(zeta), nu=int(nu), prototype_warm=int(prototype_warm),
        bs=float(bs), true_j=int(J))

    def tiled(cols):
        return pl.BlockSpec((tile_bs, cols), lambda i, c: (i, 0))

    grid_spec = pltpu.PrefetchScalarGridSpec(
        num_scalar_prefetch=1,                       # `choice` -> SMEM
        grid=(n_tiles,),
        in_specs=[tiled(K),                          # y_pred
                  tiled(1),                          # labels (int32)
                  tiled(J),                          # prototypes, original order (unpadded)
                  tiled(J),                          # prototypes, row-sorted (unpadded)
                  tiled(J)],                         # features permuted by sort idx (unpadded)
        out_specs=pl.BlockSpec((1, 1), lambda i, c: (0, 0)),
        scratch_shapes=[pltpu.VMEM((J, J), jnp.float32),         # P_unit^T P_unit accumulator
                        pltpu.VMEM((tile_bs, Jp), jnp.float32)])  # zero-padded diffs buffer

    out = pl.pallas_call(
        kernel,
        out_shape=jax.ShapeDtypeStruct((1, 1), jnp.float32),
        grid_spec=grid_spec,
        # Reduction over batch tiles with resident accumulators => "arbitrary".
        # TODO(synk): per-core partial sums + a "parallel" axis would exploit
        # v7x's 2 TensorCores; kept single-core to avoid racing the shared
        # (J,J)/(1,1) accumulators.
        compiler_params=pltpu.CompilerParams(dimension_semantics=("arbitrary",)),
    )(choice_arr, y_pred, labels, protos_cur, protos_sorted, feat_sorted)
    return out[0, 0]


def _excpr_ref(feature_vec, y_pred, y_targ, prototypes, choice, *,
               alpha=1.0, zeta=0.2, gamma=300000.0):
    """Pure-JAX reference of the PyTorch forward (prototype_warm=0, nu=-1)."""
    bs, J = feature_vec.shape
    eps = 1e-12
    logp = jax.nn.log_softmax(y_pred, axis=1)
    xent = -jnp.mean(jnp.take_along_axis(logp, y_targ[:, None], axis=1))
    loss = alpha * xent
    f_unit = feature_vec / jnp.maximum(
        jnp.linalg.norm(feature_vec, axis=1, keepdims=True), eps)
    p = prototypes[y_targ]
    p_unit = p / jnp.maximum(jnp.linalg.norm(p, axis=1, keepdims=True), eps)
    cs2 = (p_unit @ p_unit.T) ** 2
    mask = ~jnp.eye(bs, dtype=bool)
    loss = loss + zeta * jnp.sum(cs2 * mask) / (bs * (bs - 1))
    idx = jnp.argsort(p_unit, axis=1)
    p_sort = jnp.take_along_axis(p_unit, idx, axis=1)
    f_sort = jnp.take_along_axis(f_unit, idx, axis=1)
    diffs = p_sort * (f_sort - p_sort)
    left = jnp.pad(diffs, ((0, 0), (0, choice)))
    right = jnp.pad(diffs, ((0, 0), (choice, 0)))
    loss = loss + gamma * jnp.mean(jax.nn.relu(-(left * right)))
    return loss


if __name__ == "__main__":
    key = jax.random.PRNGKey(0)
    k_proto, k_feat, k_pred, k_targ, k_c1, k_c2 = jax.random.split(key, 6)

    bs, J, K = 8, 64, 16
    # deterministic synthetic "parameters" / inputs (no checkpoint loading)
    prototypes = jax.random.normal(k_proto, (K, J), jnp.float32)
    feature_vec = jax.random.normal(k_feat, (bs, J), jnp.float32)
    y_pred = jax.random.normal(k_pred, (bs, K), jnp.float32)
    y_targ = jax.random.randint(k_targ, (bs,), 0, K)

    r = 20
    choices = [jax.random.randint(k_c1, (), 1, r + 1, dtype=jnp.int32),
               jax.random.randint(k_c2, (), 1, r + 1, dtype=jnp.int32)]

    # Two different shift values exercise the single compiled executable
    # (choice is a traced runtime SMEM scalar -> no recompile between calls).
    for c in choices:
        loss = excpr_loss(feature_vec, y_pred, y_targ, prototypes, c)
        jax.block_until_ready(loss)
        ref = _excpr_ref(feature_vec, y_pred, y_targ, prototypes, int(c))
        assert jnp.allclose(loss, ref, rtol=1e-3, atol=1e-2), (float(loss), float(ref), int(c))

    print("KERNEL_OK")
</pallas_src>

<mosaic_0001>
module attributes {stable_mosaic.version = 11 : i64} {
  func.func @_excpr_kernel(%arg0: i32, %arg1: memref<1xi32, #tpu.memory_space<smem>>, %arg2: memref<8x16xf32, #tpu.memory_space<vmem>>, %arg3: memref<8x1xi32, #tpu.memory_space<vmem>>, %arg4: memref<8x64xf32, #tpu.memory_space<vmem>>, %arg5: memref<8x64xf32, #tpu.memory_space<vmem>>, %arg6: memref<8x64xf32, #tpu.memory_space<vmem>>, %arg7: memref<1x1xf32, #tpu.memory_space<vmem>>, %arg8: memref<64x64xf32, #tpu.memory_space<vmem>>, %arg9: memref<8x128xf32, #tpu.memory_space<vmem>>) attributes {dimension_semantics = [#tpu.dimension_semantics<arbitrary>], iteration_bounds = array<i64: 1>, scalar_prefetch = 1 : i64, scratch_operands = 2 : i64, tpu.core_type = #tpu.core_type<tc>, window_params = [{transform_indices = @transform_0, window_bounds = array<i64: 8, 16>}, {transform_indices = @transform_1, window_bounds = array<i64: 8, 1>}, {transform_indices = @transform_2, window_bounds = array<i64: 8, 64>}, {transform_indices = @transform_3, window_bounds = array<i64: 8, 64>}, {transform_indices = @transform_4, window_bounds = array<i64: 8, 64>}, {pipeline_mode = #tpu.pipeline_mode<synchronous>, transform_indices = @transform_5, window_bounds = array<i64: 1, 1>}]} {
    %c0_i32 = arith.constant 0 : i32
    %0 = arith.cmpi eq, %arg0, %c0_i32 : i32
    %1 = arith.extui %0 : i1 to i32
    %c0_i32_0 = arith.constant 0 : i32
    %2 = arith.cmpi ne, %1, %c0_i32_0 : i32
    scf.if %2 {
      %cst_42 = arith.constant 0.000000e+00 : f32
      %86 = vector.broadcast %cst_42 : f32 to vector<1x1xf32>
      %c0_43 = arith.constant 0 : index
      %c0_44 = arith.constant 0 : index
      %87 = vector.load %arg7[%c0_43, %c0_44] : memref<1x1xf32, #tpu.memory_space<vmem>>, vector<1x1xf32>
      tpu.vector_store %arg7[%c0_43, %c0_44], %86 {strides = array<i32>} : memref<1x1xf32, #tpu.memory_space<vmem>>, vector<1x1xf32>,
      %cst_45 = arith.constant 0.000000e+00 : f32
      %88 = vector.broadcast %cst_45 : f32 to vector<64x64xf32>
      %c0_46 = arith.constant 0 : index
      %c0_47 = arith.constant 0 : index
      %89 = vector.load %arg8[%c0_46, %c0_47] : memref<64x64xf32, #tpu.memory_space<vmem>>, vector<64x64xf32>
      tpu.vector_store %arg8[%c0_46, %c0_47], %88 {strides = array<i32>} : memref<64x64xf32, #tpu.memory_space<vmem>>, vector<64x64xf32>,
      %cst_48 = arith.constant 0.000000e+00 : f32
      %90 = vector.broadcast %cst_48 : f32 to vector<8x128xf32>
      %c0_49 = arith.constant 0 : index
      %c0_50 = arith.constant 0 : index
      %91 = vector.load %arg9[%c0_49, %c0_50] : memref<8x128xf32, #tpu.memory_space<vmem>>, vector<8x128xf32>
      tpu.vector_store %arg9[%c0_49, %c0_50], %90 {strides = array<i32>} : memref<8x128xf32, #tpu.memory_space<vmem>>, vector<8x128xf32>,
    } else {
    }
    %c0 = arith.constant 0 : index
    %c0_1 = arith.constant 0 : index
    %3 = vector.load %arg2[%c0, %c0_1] : memref<8x16xf32, #tpu.memory_space<vmem>>, vector<8x16xf32>
    %c0_2 = arith.constant 0 : index
    %c0_3 = arith.constant 0 : index
    %4 = vector.load %arg3[%c0_2, %c0_3] : memref<8x1xi32, #tpu.memory_space<vmem>>, vector<8x1xi32>
    %5 = tpu.iota {dimensions = array<i32: 1>} : vector<8x16xi32>
    %6 = vector.broadcast %4 : vector<8x1xi32> to vector<8x16xi32>
    %7 = arith.cmpi eq, %5, %6 : vector<8x16xi32>
    %cst = arith.constant 0.000000e+00 : f32
    %8 = vector.broadcast %cst : f32 to vector<8x16xf32>
    %9 = arith.select %7, %3, %8 : vector<8x16xi1>, vector<8x16xf32>
    %cst_4 = arith.constant dense<0.000000e+00> : vector<8xf32>
    %10 = vector.multi_reduction <add>, %9, %cst_4 [1] : vector<8x16xf32> to vector<8xf32>
    %11 = vector.shape_cast %10 : vector<8xf32> to vector<8x1xf32>
    %cst_5 = arith.constant dense<0xFF800000> : vector<8xf32>
    %12 = vector.multi_reduction <maximumf>, %3, %cst_5 [1] : vector<8x16xf32> to vector<8xf32>
    %13 = vector.shape_cast %12 : vector<8xf32> to vector<8x1xf32>
    %14 = vector.broadcast %13 : vector<8x1xf32> to vector<8x16xf32>
    %15 = arith.subf %3, %14 : vector<8x16xf32>
    %16 = math.exp %15 : vector<8x16xf32>
    %cst_6 = arith.constant dense<0.000000e+00> : vector<8xf32>
    %17 = vector.multi_reduction <add>, %16, %cst_6 [1] : vector<8x16xf32> to vector<8xf32>
    %18 = vector.shape_cast %17 : vector<8xf32> to vector<8x1xf32>
    %19 = math.log %18 : vector<8x1xf32>
    %20 = arith.addf %19, %13 : vector<8x1xf32>
    %21 = arith.subf %20, %11 : vector<8x1xf32>
    %cst_7 = arith.constant 1.250000e-01 : f32
    %22 = vector.broadcast %cst_7 : f32 to vector<8x1xf32>
    %23 = arith.mulf %22, %21 : vector<8x1xf32>
    %c0_8 = arith.constant 0 : index
    %c0_9 = arith.constant 0 : index
    %24 = vector.load %arg5[%c0_8, %c0_9] : memref<8x64xf32, #tpu.memory_space<vmem>>, vector<8x64xf32>
    %c0_10 = arith.constant 0 : index
    %c0_11 = arith.constant 0 : index
    %25 = vector.load %arg6[%c0_10, %c0_11] : memref<8x64xf32, #tpu.memory_space<vmem>>, vector<8x64xf32>
    %26 = arith.mulf %24, %24 : vector<8x64xf32>
    %cst_12 = arith.constant dense<0.000000e+00> : vector<8xf32>
    %27 = vector.multi_reduction <add>, %26, %cst_12 [1] : vector<8x64xf32> to vector<8xf32>
    %28 = vector.shape_cast %27 : vector<8xf32> to vector<8x1xf32>
    %cst_13 = arith.constant 1.000000e-24 : f32
    %29 = vector.broadcast %cst_13 : f32 to vector<8x1xf32>
    %30 = arith.maximumf %28, %29 : vector<8x1xf32>
    %31 = math.rsqrt %30 : vector<8x1xf32>
    %32 = arith.mulf %25, %25 : vector<8x64xf32>
    %cst_14 = arith.constant dense<0.000000e+00> : vector<8xf32>
    %33 = vector.multi_reduction <add>, %32, %cst_14 [1] : vector<8x64xf32> to vector<8xf32>
    %34 = vector.shape_cast %33 : vector<8xf32> to vector<8x1xf32>
    %cst_15 = arith.constant 1.000000e-24 : f32
    %35 = vector.broadcast %cst_15 : f32 to vector<8x1xf32>
    %36 = arith.maximumf %34, %35 : vector<8x1xf32>
    %37 = math.rsqrt %36 : vector<8x1xf32>
    %38 = vector.broadcast %31 : vector<8x1xf32> to vector<8x64xf32>
    %39 = arith.mulf %24, %38 : vector<8x64xf32>
    %40 = vector.broadcast %37 : vector<8x1xf32> to vector<8x64xf32>
    %41 = arith.mulf %25, %40 : vector<8x64xf32>
    %42 = arith.subf %41, %39 : vector<8x64xf32>
    %c0_16 = arith.constant 0 : index
    %c0_17 = arith.constant 0 : index
    %43 = vector.load %arg4[%c0_16, %c0_17] : memref<8x64xf32, #tpu.memory_space<vmem>>, vector<8x64xf32>
    %44 = vector.broadcast %31 : vector<8x1xf32> to vector<8x64xf32>
    %45 = arith.mulf %43, %44 : vector<8x64xf32>
    %c0_18 = arith.constant 0 : index
    %c0_19 = arith.constant 0 : index
    %46 = vector.load %arg8[%c0_18, %c0_19] : memref<64x64xf32, #tpu.memory_space<vmem>>, vector<64x64xf32>
    %cst_20 = arith.constant dense<0.000000e+00> : vector<64x64xf32>
    %47 = tpu.matmul %45, %45, %cst_20 {dimension_numbers = #tpu.dot_dimension_numbers<[0], [0], [1], [1], [0, 1, 1, 1], [], []>} : vector<8x64xf32>, vector<8x64xf32>, vector<64x64xf32> -> vector<64x64xf32>
    %48 = arith.addf %46, %47 : vector<64x64xf32>
    %c0_21 = arith.constant 0 : index
    %c0_22 = arith.constant 0 : index
    %49 = vector.load %arg8[%c0_21, %c0_22] : memref<64x64xf32, #tpu.memory_space<vmem>>, vector<64x64xf32>
    tpu.vector_store %arg8[%c0_21, %c0_22], %48 {strides = array<i32>} : memref<64x64xf32, #tpu.memory_space<vmem>>, vector<64x64xf32>,
    %50 = arith.mulf %45, %45 : vector<8x64xf32>
    %cst_23 = arith.constant dense<0.000000e+00> : vector<8xf32>
    %51 = vector.multi_reduction <add>, %50, %cst_23 [1] : vector<8x64xf32> to vector<8xf32>
    %52 = vector.shape_cast %51 : vector<8xf32> to vector<8x1xf32>
    %53 = arith.mulf %52, %52 : vector<8x1xf32>
    %cst_24 = arith.constant 0.00357142859 : f32
    %54 = vector.broadcast %cst_24 : f32 to vector<8x1xf32>
    %55 = arith.mulf %54, %53 : vector<8x1xf32>
    %56 = arith.subf %23, %55 : vector<8x1xf32>
    %c0_25 = arith.constant 0 : index
    %57 = memref.load %arg1[%c0_25] : memref<1xi32, #tpu.memory_space<smem>>
    %58 = arith.mulf %39, %42 : vector<8x64xf32>
    %c0_26 = arith.constant 0 : index
    %c0_27 = arith.constant 0 : index
    %59 = vector.load %arg9[%c0_26, %c0_27] : memref<8x128xf32, #tpu.memory_space<vmem>>, vector<8x64xf32>
    tpu.vector_store %arg9[%c0_26, %c0_27], %58 {strides = array<i32>} : memref<8x128xf32, #tpu.memory_space<vmem>>, vector<8x64xf32>,
    %c0_28 = arith.constant 0 : index
    %c0_29 = arith.constant 0 : index
    %60 = vector.load %arg9[%c0_28, %c0_29] : memref<8x128xf32, #tpu.memory_space<vmem>>, vector<8x128xf32>
    %61 = tpu.dynamic_rotate %60 by %57 dim 1 : vector<8x128xf32>, i32 -> vector<8x128xf32>
    %62 = arith.mulf %60, %61 : vector<8x128xf32>
    %cst_30 = arith.constant 0.000000e+00 : f32
    %63 = vector.broadcast %cst_30 : f32 to vector<8x128xf32>
    %64 = arith.subf %63, %62 : vector<8x128xf32>
    %cst_31 = arith.constant 0.000000e+00 : f32
    %65 = vector.broadcast %cst_31 : f32 to vector<8x128xf32>
    %66 = arith.maximumf %64, %65 : vector<8x128xf32>
    %67 = arith.sitofp %57 : i32 to f32
    %cst_32 = arith.constant 6.400000e+01 : f32
    %68 = arith.addf %cst_32, %67 : f32
    %cst_33 = arith.constant 3.750000e+04 : f32
    %69 = arith.divf %cst_33, %68 : f32
    %cst_34 = arith.constant dense<0.000000e+00> : vector<8xf32>
    %70 = vector.multi_reduction <add>, %66, %cst_34 [1] : vector<8x128xf32> to vector<8xf32>
    %71 = vector.shape_cast %70 : vector<8xf32> to vector<8x1xf32>
    %72 = vector.broadcast %69 : f32 to vector<8x1xf32>
    %73 = arith.mulf %72, %71 : vector<8x1xf32>
    %74 = arith.addf %56, %73 : vector<8x1xf32>
    %c0_35 = arith.constant 0 : index
    %c0_36 = arith.constant 0 : index
    %75 = vector.load %arg7[%c0_35, %c0_36] : memref<1x1xf32, #tpu.memory_space<vmem>>, vector<1x1xf32>
    %76 = vector.shape_cast %74 : vector<8x1xf32> to vector<1x8x1xf32>
    %cst_37 = arith.constant dense<0.000000e+00> : vector<1xf32>
    %77 = vector.multi_reduction <add>, %76, %cst_37 [1, 2] : vector<1x8x1xf32> to vector<1xf32>
    %78 = vector.shape_cast %77 : vector<1xf32> to vector<1x1x1xf32>
    %79 = vector.extract %78[0, 0, 0] : f32 from vector<1x1x1xf32>
    %80 = vector.broadcast %79 : f32 to vector<1x1xf32>
    %81 = arith.addf %75, %80 : vector<1x1xf32>
    %c0_38 = arith.constant 0 : index
    %c0_39 = arith.constant 0 : index
    %82 = vector.load %arg7[%c0_38, %c0_39] : memref<1x1xf32, #tpu.memory_space<vmem>>, vector<1x1xf32>
    tpu.vector_store %arg7[%c0_38, %c0_39], %81 {strides = array<i32>} : memref<1x1xf32, #tpu.memory_space<vmem>>, vector<1x1xf32>,
    %c0_i32_40 = arith.constant 0 : i32
    %83 = arith.cmpi eq, %arg0, %c0_i32_40 : i32
    %84 = arith.extui %83 : i1 to i32
    %c0_i32_41 = arith.constant 0 : i32
    %85 = arith.cmpi ne, %84, %c0_i32_41 : i32
    scf.if %85 {
      %c0_42 = arith.constant 0 : index
      %c0_43 = arith.constant 0 : index
      %86 = vector.load %arg8[%c0_42, %c0_43] : memref<64x64xf32, #tpu.memory_space<vmem>>, vector<64x64xf32>
      %c0_44 = arith.constant 0 : index
      %c0_45 = arith.constant 0 : index
      %87 = vector.load %arg7[%c0_44, %c0_45] : memref<1x1xf32, #tpu.memory_space<vmem>>, vector<1x1xf32>
      %88 = arith.mulf %86, %86 : vector<64x64xf32>
      %89 = vector.shape_cast %88 : vector<64x64xf32> to vector<1x64x64xf32>
      %cst_46 = arith.constant dense<0.000000e+00> : vector<1xf32>
      %90 = vector.multi_reduction <add>, %89, %cst_46 [1, 2] : vector<1x64x64xf32> to vector<1xf32>
      %91 = vector.shape_cast %90 : vector<1xf32> to vector<1x1x1xf32>
      %92 = vector.extract %91[0, 0, 0] : f32 from vector<1x1x1xf32>
      %cst_47 = arith.constant 0.00357142859 : f32
      %93 = arith.mulf %cst_47, %92 : f32
      %94 = vector.broadcast %93 : f32 to vector<1x1xf32>
      %95 = arith.addf %87, %94 : vector<1x1xf32>
      %c0_48 = arith.constant 0 : index
      %c0_49 = arith.constant 0 : index
      %96 = vector.load %arg7[%c0_48, %c0_49] : memref<1x1xf32, #tpu.memory_space<vmem>>, vector<1x1xf32>
      tpu.vector_store %arg7[%c0_48, %c0_49], %95 {strides = array<i32>} : memref<1x1xf32, #tpu.memory_space<vmem>>, vector<1x1xf32>,
    } else {
    }
    return
  }
  func.func @transform_0(%arg0: i32, %arg1: memref<1xi32, #tpu.memory_space<smem>>) -> (i32, i32) {
    %c0_i32 = arith.constant 0 : i32
    %c0_i32_0 = arith.constant 0 : i32
    return %arg0, %c0_i32 : i32, i32
  }
  func.func @transform_1(%arg0: i32, %arg1: memref<1xi32, #tpu.memory_space<smem>>) -> (i32, i32) {
    %c0_i32 = arith.constant 0 : i32
    %c0_i32_0 = arith.constant 0 : i32
    return %arg0, %c0_i32 : i32, i32
  }
  func.func @transform_2(%arg0: i32, %arg1: memref<1xi32, #tpu.memory_space<smem>>) -> (i32, i32) {
    %c0_i32 = arith.constant 0 : i32
    %c0_i32_0 = arith.constant 0 : i32
    return %arg0, %c0_i32 : i32, i32
  }
  func.func @transform_3(%arg0: i32, %arg1: memref<1xi32, #tpu.memory_space<smem>>) -> (i32, i32) {
    %c0_i32 = arith.constant 0 : i32
    %c0_i32_0 = arith.constant 0 : i32
    return %arg0, %c0_i32 : i32, i32
  }
  func.func @transform_4(%arg0: i32, %arg1: memref<1xi32, #tpu.memory_space<smem>>) -> (i32, i32) {
    %c0_i32 = arith.constant 0 : i32
    %c0_i32_0 = arith.constant 0 : i32
    return %arg0, %c0_i32 : i32, i32
  }
  func.func @transform_5(%arg0: i32, %arg1: memref<1xi32, #tpu.memory_space<smem>>) -> (i32, i32) {
    %c0_i32 = arith.constant 0 : i32
    %c0_i32_0 = arith.constant 0 : i32
    %c0_i32_1 = arith.constant 0 : i32
    return %c0_i32, %c0_i32_0 : i32, i32
  }
}

</mosaic_0001>

<bundles_post_ra>
// kernel: excpr_loss.1
= control target key start
LH: loop header
LB: loop body
LE: loop exit
PB: predicated region body
PF: predicated region fallthrough
CT: control target
= control target key end

     0   :  { %vm29_vm0 = vcmask 523264   ;;  %v457_v4 = vmov 0   ;;  %s580_s0 = inlined_call_operand.<no memory space> [shape: s32[1], index: 0, kind: input, shape index: {}]   ;;  %s581_s1 = inlined_call_operand.vmem [shape: f32[8,16], index: 1, kind: input, shape index: {}]   ;;  %s582_s2 = inlined_call_operand.vmem [shape: s32[8,1], index: 2, kind: input, shape index: {}]   ;;  %s583_s3 = inlined_call_operand.vmem [shape: f32[8,64], index: 3, kind: input, shape index: {}]   ;;  %s584_s4 = inlined_call_operand.vmem [shape: f32[8,64], index: 4, kind: input, shape index: {}]   ;;  %s585_s5 = inlined_call_operand.vmem [shape: f32[8,64], index: 5, kind: input, shape index: {}]   ;;  %s586_s6 = inlined_call_operand.hbm [shape: f32[1,1], index: 6, kind: output, shape index: {}]  }
   0x1   :  { %v67_v0 = vld [vmem:[%s585_s5] sm:$0xff]  ;;  %421 = vset.pattern.permute.xlu1 %v457_v4 }
   0x2   :  { %v66_v1 = vld [vmem:[%s584_s4] sm:$0xff]  ;;  %v75_v2 = vmul.f32 %v67_v0, %v67_v0 }
   0x3   :  { %v68_v3 = vmul.f32 %v66_v1, %v66_v1 }
   0x4   :  { %12 = vsyncpa [#allocation7], 0  ;;  %v39_v5 = vld [vmem:[%s581_s1] sm:$0xff]  ;;  %vm48_vm1 = vcmask 130048   ;;  %v76_v6 = vsel %vm29_vm0, %v75_v2, 0.0  ;;  %v458_v10 = vmov 0.0   ;;  %v41_v31 = vlaneseq  ;;  %s290_s7 = scvt.s32.f32 %s580_s0 }
   0x5   :  { %v70_v7 = vsel %vm29_vm0, %v68_v3, 0.0  ;;  %77 = vadd.xlane.f32.xlu1 %v76_v6  ;;  %v52_v8 = vsel %vm48_vm1, %v39_v5, -inf  ;;  %v40_v9 = vld [vmem:[%s582_s2] sm:$0xff]  ;;  %38 = vst [vmem:[#allocation3] sm:$0xff] %v458_v10  ;;  %30 = vst.msk [vmem:[#allocation2] sm:$0xff] %vm29_vm0, %v458_v10  ;;  %s283_s29 = sand.u32 127, %s580_s0  }
   0x6   :  { %71 = vadd.xlane.f32.xlu0 %v70_v7  ;;  %31 = vst.msk [vmem:[#allocation2 + $0x8] sm:$0xff] %vm29_vm0, %v458_v10  ;;  %32 = vst.msk [vmem:[#allocation2 + $0x10] sm:$0xff] %vm29_vm0, %v458_v10  ;;  %v84_v15 = vld [vmem:[%s583_s3] sm:$0xff]  ;;  %v42_v32 = vand.u32 127, %v41_v31  ;;  %s291_s8 = sadd.f32 64.0, %s290_s7  ;;  %vm126_vm3 = vcmask 64512  }
   0x7   :  { %33 = vst.msk [vmem:[#allocation2 + $0x18] sm:$0xff] %vm29_vm0, %v458_v10  ;;  %34 = vst.msk [vmem:[#allocation2 + $0x20] sm:$0xff] %vm29_vm0, %v458_v10  ;;  %vm302_vm4 = vcmask 7168   ;;  %vm27_vm5 = vcmask 0   ;;  %s459_s13 = smov [#allocation6]  }
   0x8   :  { %35 = vst.msk [vmem:[#allocation2 + $0x28] sm:$0xff] %vm29_vm0, %v458_v10  ;;  %36 = vst.msk [vmem:[#allocation2 + $0x30] sm:$0xff] %vm29_vm0, %v458_v10  ;;  %v292_v36 = vstv %s291_s8  ;;  %s371_s14 = sshll.u32 %s459_s13, 4  ;;  %s372_s14 = int_to_ptr.vmem [resolvable:$true] %s371_s14 }
   0x9   :  { %53 = vmax.xlane.f32.xlu1 %v52_v8  ;;  %37 = vst.msk [vmem:[#allocation2 + $0x38] sm:$0xff] %vm29_vm0, %v458_v10  ;;  %s433_s15 = scalar_lea.vmem %s372_s14, 16  ;;  %s437_s16 = scalar_lea.vmem %s372_s14, 32 }
   0xa   :  { %28 = vst.msk [vmem:[#allocation6] sm:$0x1] %vm27_vm5, %v458_v10  ;;  %p434_p0 = scmp.ne.s32.totalorder %s372_s14, %s433_s15  ;;  %p438_p1 = scmp.lt.s32.totalorder %s372_s14, %s372_s14 }
   0xb   :  { %p439_p2 = scmp.lt.s32.totalorder %s437_s16, %s433_s15 }
   0xc   :  { %v86_v3 = vld [vmem:[#allocation2] sm:$0xff] }
   0xd   :  { %v87_v2 = vld [vmem:[#allocation2 + $0x8] sm:$0xff]  ;;  %p440_p3 = por %p439_p2, %p438_p1 }
   0xe   :  { %v89_v8 = vld [vmem:[#allocation2 + $0x18] sm:$0xff] }
   0xf   :  { %v91_v10 = vld [vmem:[#allocation2 + $0x28] sm:$0xff]  ;;  %p441_p4 = pnand %p440_p3, %p434_p0 }
  0x1a   :  { %44 = vperm.xlu1 %421, %v40_v9   ;;  %v88_v9 = vld [vmem:[#allocation2 + $0x10] sm:$0xff] }
  0x92   :  { %v78_v11 = vpop.xlane.xlu1 %77 }
  0x93   :  { %v72_v12 = vpop.xlane.xlu0 %71  ;;  %v79_v13 = vmax.f32 %v78_v11, 1e-24 }
  0x94   :  { %v73_v14 = vmax.f32 %v72_v12, 1e-24 }
  0x95   :  { %423 = vrsqrt.f32 %v79_v13 }
  0x96   :  { %425 = vrsqrt.f32 %v73_v14  ;;  %v54_v24 = vpop.xlane.xlu1 %53 }
  0x97   :  { %v55_v25 = vsub.f32 %v39_v5, %v54_v24 }
  0x99   :  { %v56_v26 = vmul.f32 1.442695, %v55_v25 }
  0x9a   :  { %v45_v33 = vpop.permute.xlu1 %44 }
  0x9b   :  { %427 = vpow2.f32 %v56_v26  ;;  %vm46_vm2 = vcmp.eq.s32.totalorder %v42_v32, %v45_v33  ;;  %v93_v26 = vld [vmem:[#allocation2 + $0x38] sm:$0xff] }
  0x9c   :  { %v47_v34 = vsel %vm46_vm2, %v39_v5, 0.0  ;;  %429 = vrcp.f32 %v292_v36 }
  0x9d   :  { %v49_v35 = vsel %vm48_vm1, %v47_v34, 0.0 }
  0x9f   :  { %v424_v16 = vpop.eup %423 }
  0xa0   :  { %v426_v17 = vpop.eup %425  ;;  %v82_v18 = vmul.f32 %v424_v16, %v67_v0 }
  0xa1   :  { %v81_v19 = vmul.f32 %v426_v17, %v66_v1  ;;  %v85_v20 = vmul.f32 %v426_v17, %v84_v15  ;;  %v90_v15 = vld [vmem:[#allocation2 + $0x20] sm:$0xff] }
  0xa3   :  { %v83_v21 = vsub.f32 %v82_v18, %v81_v19  ;;  %94 = vxpose.xlu0.b32.start.end [1/1] (short) (narrow) %v85_v20, 64  ;;  %396 = vmatprep.subr.mxu0 %v85_v20  ;;  %v272_v29 = vmul.f32 %v85_v20, %v85_v20 }
  0xa4   :  { %410 = vmatprep.subr.mxu1 %v85_v20  ;;  %397 = vmatpush3.msra.mxu0 %v85_v20 }
  0xa5   :  { %v280_v22 = vmul.f32 %v83_v21, %v81_v19  ;;  %411 = vmatpush3.msra.mxu1 %v85_v20  ;;  %v428_v27 = vpop.eup %427  ;;  %v273_v30 = vsel %vm29_vm0, %v272_v29, 0.0  ;;  %v92_v29 = vld [vmem:[#allocation2 + $0x30] sm:$0xff] }
  0xa6   :  { %v58_v28 = vsel %vm48_vm1, %v428_v27, 0.0  ;;  %v430_v37 = vpop.eup %429 }
  0xa7   :  { %281 = vst.msk [vmem:[#allocation3] sm:$0xff] %vm29_vm0, %v280_v22 }
  0xa8   :  { %412 = vpush %v430_v37 }
  0xae   :  { %v282_v23 = vld [vmem:[#allocation3] sm:$0xff] }
  0xaf   :  { %285 = vrot.lane.b32.xlu1 %v282_v23, %s283_s29 }
  0xcc   :  { %422 = vset.pattern.permute.xlu0 %v457_v4 }
  0xd3   :  { %59 = vadd.xlane.f32.xlu1 %v58_v28 }
  0xd7   :  { %274 = vadd.xlane.f32.xlu1 %v273_v30 }
  0xd9   :  { %s413_s0 = spop %412 }
  0xda   :  { %s295_s9 = smul.f32 37500.0, %s413_s0 }
  0xdc   :  { %v298_v59 = vstv %s295_s9 }
  0xec   :  { %50 = vadd.xlane.f32.xlu0 %v49_v35 }
 0x121   :  { %v286_v38 = vpop.permute.xlu1 %285 }
 0x122   :  { %v287_v39 = vmul.f32 %v286_v38, %v282_v23 }
 0x123   :  { %v110_v40 = vpop.trf.xlu0 }
 0x124   :  { %v288_v41 = vsub.f32 0.0, %v287_v39  ;;  %398 = vmatprep.mubr.msk.f32.mxu0 %vm126_vm3, %v110_v40 }
 0x126   :  { %v289_v42 = vmax.f32 %v288_v41, 0.0 }
 0x127   :  { %v111_v43 = vpop.trf.xlu0 }
 0x128   :  { %399 = vmatmul.mubr.msk.f32.vlgmr.msra.gmra.mrb[0].mxu0 %vm126_vm3, %v111_v43  ;;  %296 = vadd.xlane.f32.xlu1 %v289_v42 }
 0x12b   :  { %v112_v44 = vpop.trf.xlu0 }
 0x12c   :  { %401 = vmatprep.mubr.msk.f32.mxu0 %vm126_vm3, %v112_v44 }
 0x12f   :  { %v113_v45 = vpop.trf.xlu0 }
 0x130   :  { %402 = vmatmul.mubr.msk.f32.gmra.mrb[2].mxu0 %vm126_vm3, %v113_v45 }
 0x133   :  { %v114_v46 = vpop.trf.xlu0 }
 0x134   :  { %404 = vmatprep.mubr.msk.f32.mxu1 %vm126_vm3, %v114_v46 }
 0x137   :  { %v115_v47 = vpop.trf.xlu0 }
 0x138   :  { %405 = vmatmul.mubr.msk.f32.vlgmr.msra.gmra.mrb[0].mxu1 %vm126_vm3, %v115_v47 }
 0x13b   :  { %v116_v48 = vpop.trf.xlu0 }
 0x13c   :  { %407 = vmatprep.mubr.msk.f32.mxu1 %vm126_vm3, %v116_v48 }
 0x13f   :  { %v117_v49 = vpop.trf.xlu0 }
 0x140   :  { %408 = vmatmul.mubr.msk.f32.gmra.mrb[2].mxu1 %vm126_vm3, %v117_v49 }
 0x160   :  { %v60_v50 = vpop.xlane.xlu1 %59 }
 0x161   :  { %431 = vlog2.f32 %v60_v50 }
 0x164   :  { %v275_v55 = vpop.xlane.xlu1 %274 }
 0x165   :  { %v276_v57 = vmul.f32 %v275_v55, %v275_v55 }
 0x167   :  { %v277_v60 = vmul.f32 0.0035714286, %v276_v57 }
 0x16b   :  { %v432_v51 = vpop.eup %431 }
 0x16c   :  { %v62_v52 = vmul.f32 0.6931472, %v432_v51 }
 0x16e   :  { %v63_v54 = vadd.f32 %v62_v52, %v54_v24 }
 0x179   :  { %v51_v53 = vpop.xlane.xlu0 %50 }
 0x17a   :  { %v64_v56 = vsub.f32 %v63_v54, %v51_v53 }
 0x17c   :  { %v65_v58 = vmul.f32 0.125, %v64_v56 }
 0x17e   :  { %v278_v62 = vsub.f32 %v65_v58, %v277_v60 }
 0x1b5   :  { %v297_v61 = vpop.xlane.xlu1 %296 }
 0x1b6   :  { %v299_v63 = vmul.f32 %v298_v59, %v297_v61 }
 0x1b8   :  { %v300_v0 = vadd.f32 %v299_v63, %v278_v62 }
 0x1ba   :  { %v303_v1 = vsel %vm302_vm4, %v300_v0, 0.0  ;;  %v301_v0 = vld [vmem:[#allocation6] sm:$0x1] }
 0x1bb   :  { %304 = vadd.xlane.f32.xlu1 %v303_v1 }
 0x1fb   :  { %v400_v4 = vpop.f32.mrb[0].mxu0 }
 0x1fc   :  { %v257_v5 = vadd.f32 %v400_v4, %v87_v2  ;;  %v217_v6 = vpop.f32.mrb[1].mxu0 }
 0x1fd   :  { %v256_v7 = vadd.f32 %v217_v6, %v86_v3 }
 0x1fe   :  { %265 = vst.msk [vmem:[#allocation2 + $0x8] sm:$0xff] %vm29_vm0, %v257_v5 }
 0x1ff   :  { %264 = vst.msk [vmem:[#allocation2] sm:$0xff] %vm29_vm0, %v256_v7 }
 0x203   :  { %v403_v11 = vpop.f32.mrb[2].mxu0 }
 0x204   :  { %v259_v12 = vadd.f32 %v403_v11, %v89_v8  ;;  %v227_v13 = vpop.f32.mrb[3].mxu0 }
 0x205   :  { %v258_v14 = vadd.f32 %v227_v13, %v88_v9  ;;  %v321_v17 = vld [vmem:[#allocation2 + $0x8] sm:$0xff] }
 0x206   :  { %267 = vst.msk [vmem:[#allocation2 + $0x18] sm:$0xff] %vm29_vm0, %v259_v12  ;;  %v320_v16 = vld [vmem:[#allocation2] sm:$0xff]  ;;  %v330_v23 = vmul.f32 %v321_v17, %v321_v17 }
 0x207   :  { %266 = vst.msk [vmem:[#allocation2 + $0x10] sm:$0xff] %vm29_vm0, %v258_v14  ;;  %v329_v22 = vmul.f32 %v320_v16, %v320_v16 }
 0x208   :  { %v338_v28 = vsel %vm29_vm0, %v330_v23, 0.0 }
 0x209   :  { %v337_v27 = vsel %vm29_vm0, %v329_v22, 0.0 }
 0x20a   :  { %v339_v35 = vadd.f32 %v338_v28, %v337_v27 }
 0x20b   :  { %v406_v18 = vpop.f32.mrb[0].mxu1 }
 0x20c   :  { %v261_v19 = vadd.f32 %v406_v18, %v91_v10  ;;  %v237_v20 = vpop.f32.mrb[1].mxu1 }
 0x20d   :  { %v260_v21 = vadd.f32 %v237_v20, %v90_v15  ;;  %v323_v30 = vld [vmem:[#allocation2 + $0x18] sm:$0xff] }
 0x20e   :  { %269 = vst.msk [vmem:[#allocation2 + $0x28] sm:$0xff] %vm29_vm0, %v261_v19  ;;  %v322_v24 = vld [vmem:[#allocation2 + $0x10] sm:$0xff]  ;;  %v332_v37 = vmul.f32 %v323_v30, %v323_v30 }
 0x20f   :  { %268 = vst.msk [vmem:[#allocation2 + $0x20] sm:$0xff] %vm29_vm0, %v260_v21  ;;  %v331_v25 = vmul.f32 %v322_v24, %v322_v24 }
 0x210   :  { %v342_v42 = vsel %vm29_vm0, %v332_v37, 0.0 }
 0x211   :  { %v340_v32 = vsel %vm29_vm0, %v331_v25, 0.0 }
 0x212   :  { %v341_v39 = vadd.f32 %v340_v32, %v339_v35 }
 0x213   :  { %v409_v31 = vpop.f32.mrb[2].mxu1 }
 0x214   :  { %v263_v33 = vadd.f32 %v409_v31, %v93_v26  ;;  %v247_v34 = vpop.f32.mrb[3].mxu1  ;;  %v343_v44 = vadd.f32 %v342_v42, %v341_v39 }
 0x215   :  { %v262_v36 = vadd.f32 %v247_v34, %v92_v29  ;;  %v325_v41 = vld [vmem:[#allocation2 + $0x28] sm:$0xff] }
 0x216   :  { %271 = vst.msk [vmem:[#allocation2 + $0x38] sm:$0xff] %vm29_vm0, %v263_v33  ;;  %v324_v38 = vld [vmem:[#allocation2 + $0x20] sm:$0xff]  ;;  %v334_v45 = vmul.f32 %v325_v41, %v325_v41 }
 0x217   :  { %270 = vst.msk [vmem:[#allocation2 + $0x30] sm:$0xff] %vm29_vm0, %v262_v36  ;;  %v333_v40 = vmul.f32 %v324_v38, %v324_v38 }
 0x218   :  { %v346_v51 = vsel %vm29_vm0, %v334_v45, 0.0 }
 0x219   :  { %v344_v43 = vsel %vm29_vm0, %v333_v40, 0.0 }
 0x21a   :  { %v345_v46 = vadd.f32 %v344_v43, %v343_v44 }
 0x21c   :  { %v347_v52 = vadd.f32 %v346_v51, %v345_v46 }
 0x21d   :  { %v327_v47 = vld [vmem:[#allocation2 + $0x38] sm:$0xff] }
 0x21e   :  { %v326_v48 = vld [vmem:[#allocation2 + $0x30] sm:$0xff]  ;;  %v336_v50 = vmul.f32 %v327_v47, %v327_v47 }
 0x21f   :  { %v335_v49 = vmul.f32 %v326_v48, %v326_v48 }
 0x220   :  { %v350_v55 = vsel %vm29_vm0, %v336_v50, 0.0 }
 0x221   :  { %v348_v53 = vsel %vm29_vm0, %v335_v49, 0.0 }
 0x222   :  { %v349_v54 = vadd.f32 %v348_v53, %v347_v52 }
 0x224   :  { %v351_v56 = vadd.f32 %v350_v55, %v349_v54 }
 0x226   :  { %352 = vadd.xlane.f32.xlu1 %v351_v56 }
 0x248   :  { %v305_v57 = vpop.xlane.xlu1 %304 }
 0x249   :  { %v306_v58 = vrot.slane %v305_v57, 4 }
 0x24b   :  { %v307_v59 = vadd.f32 %v306_v58, %v305_v57 }
 0x24d   :  { %v308_v60 = vrot.slane %v307_v59, 2 }
 0x24f   :  { %v309_v61 = vadd.f32 %v308_v60, %v307_v59 }
 0x251   :  { %v310_v62 = vrot.slane %v309_v61, 1 }
 0x253   :  { %v311_v63 = vadd.f32 %v310_v62, %v309_v61 }
 0x255   :  { %414 = vpush %v311_v63 }
 0x286   :  { %s415_s10 = spop %414 }
 0x287   :  { %v313_v1 = vstv %s415_s10 }
 0x288   :  { %v314_v2 = vadd.f32 %v313_v1, %v301_v0 }
 0x28a   :  { %316 = vst.msk [vmem:[#allocation6] sm:$0x1] %vm27_vm5, %v314_v2 }
 0x291   :  { %v328_v11 = vld [vmem:[#allocation6] sm:$0x1] }
 0x2b3   :  { %v353_v3 = vpop.xlane.xlu1 %352 }
 0x2b4   :  { %v354_v4 = vrot.slane %v353_v3, 4 }
 0x2b6   :  { %v355_v5 = vadd.f32 %v354_v4, %v353_v3 }
 0x2b8   :  { %v356_v6 = vrot.slane %v355_v5, 2 }
 0x2ba   :  { %v357_v7 = vadd.f32 %v356_v6, %v355_v5 }
 0x2bc   :  { %v358_v8 = vrot.slane %v357_v7, 1 }
 0x2be   :  { %v359_v9 = vadd.f32 %v358_v8, %v357_v7 }
 0x2c0   :  { %416 = vpush %v359_v9 }
 0x2f1   :  { %s417_s11 = spop %416 }
 0x2f2   :  { %s361_s12 = smul.f32 0.0035714286, %s417_s11 }
 0x2f4   :  { %v362_v12 = vstv %s361_s12 }
 0x2f5   :  { %v363_v13 = vadd.f32 %v362_v12, %v328_v11 }
 0x2f7   :  { %364 = vst.msk [vmem:[#allocation6] sm:$0x1] %vm27_vm5, %v363_v13 }
 0x2f8   :  { %444 = shalt.err (!%p441_p4)
}
 0x2f9   :  { %s445_s19 = scalar_lea.hbm %s586_s6, 16 }
 0x2fa   :  { %p446_p5 = scmp.ne.s32.totalorder %s586_s6, %s445_s19  ;;  %p449_p6 = scmp.lt.u32.totalorder %s445_s19, %s586_s6 }
 0x2fc   :  { %p451_p7 = pnand %p449_p6, %p446_p5 }
 0x2fe   :  { %454 = shalt.err (!%p451_p7)
}
 0x2ff   :  { %374 = dma.vmem_to_hbm [thread:$0]  %s372_s14, 16, %s586_s6, [#allocation7]  }
 0x300   :  { %455 = dma.done.wait [#allocation7], 16  }
 0x301   :  { %456 = vsyncadd [#allocation7], 4294967280 }
 0x302   :  { %378 = vsyncpa [#allocation7], 1 }

</bundles_post_ra>
